<compile_context>
chip_gen: v5e
topology: v5e:2x2
jax: 0.10.0
libtpu: 0.0.40
codegen_flags: <defaults>
</compile_context>

<pallas_src>
import math

import numpy as np
import jax
import jax.numpy as jnp
from jax.experimental import pallas as pl
from jax.experimental.pallas import tpu as pltpu


# ----------------------------- Pallas kernel --------------------------------

def _dct_pool_kernel(x_ref, w_ref, o_ref):
    """Fused (x * dct_weight) -> sum over spatial positions.

    x_ref: (nb, C, HW)  activation tile, spatial flattened into the lane dim
    w_ref: (C, HW)      DCT filter (shared across batch, VMEM-resident)
    o_ref: (nb, 1, C)   spectral pooling result for this batch tile
    """
    prod = x_ref[...] * w_ref[...]                 # VPU elementwise, HW lane-dense
    o_ref[:, 0, :] = jnp.sum(prod, axis=-1).astype(o_ref.dtype)   # XLU lane reduce


# ------------------------------- Wrapper -------------------------------------

def multispectral_dct_pool(x, weight, *, vmem_budget_bytes=4 << 20):
    """x: (N, C, H, W) NCHW (same layout the PyTorch module consumes).
    weight: (C, H, W) DCT filter buffer.  Returns (N, C)."""
    N, C, H, W = x.shape
    assert weight.shape == (C, H, W)
    HW = H * W

    xf = x.reshape(N, C, HW)                       # spatial -> lane dim
    wf = weight.reshape(C, HW)

    # Batch tile: whole batch in one grid step when small (launch-overhead bound);
    # otherwise the largest divisor of N whose activation tile fits the budget.
    per_image = C * HW * x.dtype.itemsize
    nb = max(1, min(N, vmem_budget_bytes // max(per_image, 1)))
    while N % nb:
        nb -= 1
    grid = (N // nb,)
    # TODO(synk): for feature maps too large for a single VMEM tile per image,
    # additionally tile the HW reduction axis with an accumulator (pl.when init/finalize).

    out = pl.pallas_call(
        _dct_pool_kernel,
        out_shape=jax.ShapeDtypeStruct((N, 1, C), x.dtype),
        grid=grid,
        in_specs=[
            pl.BlockSpec((nb, C, HW), lambda i: (i, 0, 0)),   # activations
            pl.BlockSpec((C, HW), lambda i: (0, 0)),          # DCT filter (resident)
        ],
        out_specs=pl.BlockSpec((nb, 1, C), lambda i: (i, 0, 0)),
        compiler_params=pltpu.CompilerParams(dimension_semantics=("parallel",)),
    )(xf, wf)
    return out.reshape(N, C)


# --------------------- DCT filter construction (host side) -------------------

def _build_filter(pos, freq, POS):
    result = math.cos(math.pi * freq * (pos + 0.5) / POS) / math.sqrt(POS)
    if freq == 0:
        return result
    return result * math.sqrt(2)


def get_dct_filter(tile_size_x, tile_size_y, mapper_x, mapper_y, channel):
    assert len(mapper_x) == len(mapper_y)
    assert channel % len(mapper_x) == 0
    dct_filter = np.zeros((channel, tile_size_x, tile_size_y), dtype=np.float32)
    c_part = channel // len(mapper_x)
    for i, (u_x, v_y) in enumerate(zip(mapper_x, mapper_y)):
        for t_x in range(tile_size_x):
            for t_y in range(tile_size_y):
                dct_filter[i * c_part:(i + 1) * c_part, t_x, t_y] = (
                    _build_filter(t_x, u_x, tile_size_x)
                    * _build_filter(t_y, v_y, tile_size_y))
    return jnp.asarray(dct_filter)


# --------------------------------- Main ---------------------------------------

if __name__ == "__main__":
    key = jax.random.PRNGKey(0)
    N, C, H, W = 2, 16, 16, 16
    mapper_x = [0, 0, 1, 2]          # num_freq = 4; channel % num_freq == 0
    mapper_y = [0, 1, 0, 2]

    weight = get_dct_filter(H, W, mapper_x, mapper_y, C)          # (C, H, W) buffer
    x = jax.random.normal(key, (N, C, H, W), jnp.float32)         # NCHW input

    forward = jax.jit(multispectral_dct_pool)
    out = jax.block_until_ready(forward(x, weight))

    assert out.shape == (N, C) and out.dtype == jnp.float32
    ref = jnp.sum(x * weight[None], axis=(2, 3))                  # pure-JAX reference
    assert jnp.allclose(out, ref, atol=1e-4, rtol=1e-4), float(
        jnp.max(jnp.abs(out - ref)))
    print("KERNEL_OK")
</pallas_src>

<mosaic_0001>
module attributes {stable_mosaic.version = 11 : i64} {
  func.func @_dct_pool_kernel(%arg0: i32, %arg1: memref<2x16x256xf32, #tpu.memory_space<vmem>>, %arg2: memref<16x256xf32, #tpu.memory_space<vmem>>, %arg3: memref<2x1x16xf32, #tpu.memory_space<vmem>>) attributes {dimension_semantics = [#tpu.dimension_semantics<parallel>], iteration_bounds = array<i64: 1>, scalar_prefetch = 0 : i64, scratch_operands = 0 : i64, tpu.core_type = #tpu.core_type<tc>, window_params = [{transform_indices = @transform_0, window_bounds = array<i64: 2, 16, 256>}, {pipeline_mode = #tpu.pipeline_mode<synchronous>, transform_indices = @transform_1, window_bounds = array<i64: 16, 256>}, {transform_indices = @transform_2, window_bounds = array<i64: 2, 1, 16>}]} {
    %c0 = arith.constant 0 : index
    %c0_0 = arith.constant 0 : index
    %c0_1 = arith.constant 0 : index
    %0 = vector.load %arg1[%c0, %c0_0, %c0_1] : memref<2x16x256xf32, #tpu.memory_space<vmem>>, vector<2x16x256xf32>
    %c0_2 = arith.constant 0 : index
    %c0_3 = arith.constant 0 : index
    %1 = vector.load %arg2[%c0_2, %c0_3] : memref<16x256xf32, #tpu.memory_space<vmem>>, vector<16x256xf32>
    %2 = vector.shape_cast %1 : vector<16x256xf32> to vector<1x16x256xf32>
    %3 = vector.broadcast %2 : vector<1x16x256xf32> to vector<2x16x256xf32>
    %4 = arith.mulf %0, %3 : vector<2x16x256xf32>
    %cst = arith.constant dense<0.000000e+00> : vector<2x16xf32>
    %5 = vector.multi_reduction <add>, %4, %cst [2] : vector<2x16x256xf32> to vector<2x16xf32>
    %c0_4 = arith.constant 0 : index
    %c0_5 = arith.constant 0 : index
    %c0_6 = arith.constant 0 : index
    %6 = vector.load %arg3[%c0_4, %c0_5, %c0_6] : memref<2x1x16xf32, #tpu.memory_space<vmem>>, vector<2x1x16xf32>
    %7 = vector.shape_cast %6 : vector<2x1x16xf32> to vector<2x16xf32>
    %8 = vector.shape_cast %5 : vector<2x16xf32> to vector<2x1x16xf32>
    tpu.vector_store %arg3[%c0_4, %c0_5, %c0_6], %8 {strides = array<i32>} : memref<2x1x16xf32, #tpu.memory_space<vmem>>, vector<2x1x16xf32>,
    return
  }
  func.func @transform_0(%arg0: i32) -> (i32, i32, i32) {
    %c0_i32 = arith.constant 0 : i32
    %c0_i32_0 = arith.constant 0 : i32
    %c0_i32_1 = arith.constant 0 : i32
    return %arg0, %c0_i32, %c0_i32_0 : i32, i32, i32
  }
  func.func @transform_1(%arg0: i32) -> (i32, i32) {
    %c0_i32 = arith.constant 0 : i32
    %c0_i32_0 = arith.constant 0 : i32
    %c0_i32_1 = arith.constant 0 : i32
    return %c0_i32, %c0_i32_0 : i32, i32
  }
  func.func @transform_2(%arg0: i32) -> (i32, i32, i32) {
    %c0_i32 = arith.constant 0 : i32
    %c0_i32_0 = arith.constant 0 : i32
    %c0_i32_1 = arith.constant 0 : i32
    return %arg0, %c0_i32, %c0_i32_0 : i32, i32, i32
  }
}

</mosaic_0001>

<bundles_post_ra>
// kernel: multispectral_dct_pool.1
= control target key start
LH: loop header
LB: loop body
LE: loop exit
PB: predicated region body
PF: predicated region fallthrough
CT: control target
= control target key end

     0   :  { %s167_s0 = inlined_call_operand.vmem [shape: f32[2,16,256], index: 0, kind: input, shape index: {}]   ;;  %s168_s1 = inlined_call_operand.vmem [shape: f32[16,256], index: 1, kind: input, shape index: {}]   ;;  %s169_s2 = inlined_call_operand.hbm [shape: f32[2,1,16], index: 2, kind: output, shape index: {}]  }
   0x1   :  { %v16_v0 = vld [vmem:[%s167_s0 + $0x20] sm:$0xff]  ;;  %v17_v1 = vld [vmem:[%s167_s0 + $0x28] sm:$0xff]  ;;  %v18_v10 = vld [vmem:[%s167_s0 + $0x30] sm:$0xff] }
   0x2   :  { %v20_v2 = vld [vmem:[%s168_s1] sm:$0xff]  ;;  %v21_v3 = vld [vmem:[%s168_s1 + $0x8] sm:$0xff]  ;;  %v19_v11 = vld [vmem:[%s167_s0 + $0x38] sm:$0xff] }
   0x3   :  { %v28_v4 = vmul.f32 %v20_v2, %v16_v0  ;;  %v12_v5 = vld [vmem:[%s167_s0] sm:$0xff]  ;;  %v13_v6 = vld [vmem:[%s167_s0 + $0x8] sm:$0xff]  ;;  %v29_v7 = vmul.f32 %v21_v3, %v17_v1  ;;  %v22_v12 = vld [vmem:[%s168_s1 + $0x10] sm:$0xff] }
   0x4   :  { %v24_v8 = vmul.f32 %v20_v2, %v12_v5  ;;  %v25_v9 = vmul.f32 %v21_v3, %v13_v6  ;;  %v23_v13 = vld [vmem:[%s168_s1 + $0x18] sm:$0xff]  ;;  %v14_v14 = vld [vmem:[%s167_s0 + $0x10] sm:$0xff] }
   0x5   :  { %v15_v15 = vld [vmem:[%s167_s0 + $0x18] sm:$0xff]  ;;  %v38_v16 = vadd.f32 %v29_v7, %v28_v4 }
   0x6   :  { %v32_v17 = vadd.f32 %v25_v9, %v24_v8 }
   0x7   :  { %7 = vsyncpa [#allocation3], 0  ;;  %v30_v18 = vmul.f32 %v22_v12, %v18_v10  ;;  %39 = vadd.xlane.f32.xlu1 %v38_v16  ;;  %v31_v19 = vmul.f32 %v23_v13, %v19_v11  ;;  %v26_v20 = vmul.f32 %v22_v12, %v14_v14  ;;  %v27_v21 = vmul.f32 %v23_v13, %v15_v15  ;;  %s110_s1 = smov [#allocation2]   ;;  %s69_s7 = sshll.u32 %s169_s2, 4  ;;  %s70_s7 = int_to_ptr.hbm [resolvable:$true] %s69_s7 }
   0x8   :  { %33 = vadd.xlane.f32.xlu0 %v32_v17  ;;  %v48_v24 = vlaneseq  ;;  %s67_s0 = sshll.u32 %s110_s1, 4  ;;  %vm53_vm0 = vcmask 130112   ;;  %vm60_vm1 = vcmask 122880   ;;  %s111_s8 = smov 16   ;;  %s68_s0 = int_to_ptr.vmem [resolvable:$true] %s67_s0 }
   0x9   :  { %v41_v22 = vadd.f32 %v31_v19, %v30_v18  ;;  %v35_v23 = vadd.f32 %v27_v21, %v26_v20  ;;  %s112_s9 = smov 1  }
   0xa   :  { %v49_v27 = vand.u32 127, %v48_v24 }
   0xc   :  { %v51_v28 = vadd.s32 4294967288, %v49_v27 }
   0xf   :  { %42 = vadd.xlane.f32.xlu1 %v41_v22 }
  0x10   :  { %36 = vadd.xlane.f32.xlu0 %v35_v23 }
  0x7a   :  { %v40_v25 = vpop.xlane.xlu1 %39 }
  0x7b   :  { %v34_v26 = vpop.xlane.xlu0 %33  ;;  %v55_v31 = vperm.slane %v40_v25, %v49_v27 }
  0x7c   :  { %v50_v32 = vperm.slane %v34_v26, %v49_v27 }
  0x82   :  { %v43_v29 = vpop.xlane.xlu1 %42 }
  0x83   :  { %v37_v30 = vpop.xlane.xlu0 %36  ;;  %v56_v33 = vperm.slane %v43_v29, %v51_v28 }
  0x84   :  { %v52_v34 = vperm.slane %v37_v30, %v51_v28 }
  0x85   :  { %v57_v35 = vsel %vm53_vm0, %v56_v33, %v55_v31 }
  0x86   :  { %v54_v36 = vsel %vm53_vm0, %v52_v34, %v50_v32  ;;  %62 = vst.msk [vmem:[#allocation2 + $0x1] sm:$0x1] %vm60_vm1, %v57_v35 }
  0x87   :  { %61 = vst.msk [vmem:[#allocation2] sm:$0x1] %vm60_vm1, %v54_v36 }
  0x88   :  { %75 = dma.vmem_to_hbm [thread:$0]  %s68_s0, 32, %s70_s7, [#allocation3], %s111_s8, %s111_s8, %s112_s9  }
  0x89   :  { %108 = dma.done.wait [#allocation3], 32  }
  0x8a   :  { %109 = vsyncadd [#allocation3], 4294967264 }
  0x8b   :  { %80 = vsyncpa [#allocation3], 1 }

</bundles_post_ra>
